<compile_context>
chip_gen: v6e
topology: v6e:2x2x1
jax: 0.10.0
libtpu: 0.0.40
codegen_flags: <defaults>
</compile_context>

<pallas_src>
import jax
import jax.numpy as jnp
from jax.experimental import pallas as pl
from jax.experimental.pallas import tpu as pltpu


def _round_up(x: int, m: int) -> int:
    return ((x + m - 1) // m) * m


def _chip_caps(compute_bytes: int):
    """Per-generation tile caps and a safe VMEM request ceiling."""
    try:
        vmem_bytes = int(pltpu.get_tpu_info().vmem_capacity_bytes)
    except Exception:
        vmem_bytes = 64 * 1024 * 1024  # assume the most constrained chip (v7x)
    if vmem_bytes >= 100 * 1024 * 1024:
        # v5e / v6e: 128 MiB VMEM, lowest HBM BW -> big tiles amortize DMA best.
        tm_cap, tn_cap, tk_cap = 512, 512, 1024
        vmem_cap = 96 * 1024 * 1024
    else:
        # v7x: 64 MiB VMEM, 2 TCs, ~2x HBM BW -> smaller tiles, tighter cap.
        tm_cap, tn_cap, tk_cap = 256, 256, 512
        if compute_bytes <= 2:  # bf16 weights/activations: wider K/N tiles fit.
            tn_cap, tk_cap = 512, 1024
        vmem_cap = 48 * 1024 * 1024
    return tm_cap, tn_cap, tk_cap, vmem_cap


def _pick_tile(user, dim, cap, align):
    """Return (tile, padded_dim).  Full-dim tiles need no padding/alignment."""
    t = min(user if user is not None else cap, dim)
    if t >= dim:
        return dim, dim
    t = _round_up(t, align)
    if t >= dim:
        return dim, dim
    return t, _round_up(dim, t)


def _pick_et(E, tm, tn, user):
    """Ensemble members packed per grid step."""
    if user is not None:
        return max(1, min(user, E))
    if tm * tn > 128 * 256:
        return 1  # per-member tile is already big enough to amortize overhead
    cap = 8
    if E >= 2:
        cap = min(cap, max(1, E // 2))  # keep >=2 ensemble blocks (v7x: 2 TCs)
    best = 1
    for d in range(1, cap + 1):
        if E % d == 0:
            best = d  # largest divisor of E <= cap -> no padded (wasted) members
    return best


def _build_kernel(has_bias: bool, multi_k: bool, use_scratch: bool):
    """Specialized kernel variants (bias / no-bias, single-K, scratch / in-place)."""

    def body(x_ref, w_ref, b_ref, o_ref, acc_ref):
        # Batched MXU matmul over the packed ensemble slice, f32 accumulation.
        part = jax.lax.dot_general(
            x_ref[...], w_ref[...],
            dimension_numbers=(((2,), (1,)), ((0,), (0,))),
            preferred_element_type=jnp.float32)

        if not multi_k:
            if has_bias:
                part = part + b_ref[...]
            o_ref[...] = part.astype(o_ref.dtype)
            return

        k = pl.program_id(3)
        # f32 outputs accumulate directly into the VMEM-resident output block
        # (its block index ignores k); otherwise use the f32 scratch.
        acc = acc_ref if use_scratch else o_ref

        @pl.when(k == 0)
        def _init():
            acc[...] = part

        @pl.when(k > 0)
        def _accum():
            acc[...] += part

        if use_scratch or has_bias:
            @pl.when(k == pl.num_programs(3) - 1)
            def _finalize():
                res = acc_ref[...] if use_scratch else o_ref[...]
                if has_bias:
                    res = res + b_ref[...]
                o_ref[...] = res.astype(o_ref.dtype)

    if has_bias and use_scratch:
        def kernel(x_ref, w_ref, b_ref, o_ref, acc_ref):
            body(x_ref, w_ref, b_ref, o_ref, acc_ref)
    elif has_bias:
        def kernel(x_ref, w_ref, b_ref, o_ref):
            body(x_ref, w_ref, b_ref, o_ref, None)
    elif use_scratch:
        def kernel(x_ref, w_ref, o_ref, acc_ref):
            body(x_ref, w_ref, None, o_ref, acc_ref)
    else:
        def kernel(x_ref, w_ref, o_ref):
            body(x_ref, w_ref, None, o_ref, None)
    return kernel


def ensemble_linear(x, weight, bias=None, *, tm=None, tn=None, tk=None,
                    et=None, compute_dtype=None):
    """x: (E, B, IN), weight: (E, IN, OUT), bias: (E, 1, OUT) or None -> (E, B, OUT)."""
    E, B, IN = x.shape
    Ew, INw, OUT = weight.shape
    assert (Ew, INw) == (E, IN), "weight shape mismatch"
    out_dtype = x.dtype
    cdt = jnp.dtype(compute_dtype if compute_dtype is not None else x.dtype)
    has_bias = bias is not None

    # ---- tile selection (full-dim tiles when the dim fits; else aligned tiles) ----
    tm_cap, tn_cap, tk_cap, vmem_cap = _chip_caps(cdt.itemsize)
    tm, Mp = _pick_tile(tm, B, tm_cap, 8)
    tn, Np = _pick_tile(tn, OUT, tn_cap, 128)
    tk, Kp = _pick_tile(tk, IN, tk_cap, 128)
    et = _pick_et(E, tm, tn, et)
    Ep = _round_up(E, et)

    nk = Kp // tk
    multi_k = nk > 1
    use_scratch = multi_k and jnp.dtype(out_dtype) != jnp.dtype(jnp.float32)

    # ---- cast + pad only when needed (zero K-padding keeps the reduction exact) ----
    xp = x.astype(cdt) if cdt != x.dtype else x
    wp = weight.astype(cdt) if cdt != weight.dtype else weight
    if (Ep, Mp, Kp) != (E, B, IN):
        xp = jnp.pad(xp, ((0, Ep - E), (0, Mp - B), (0, Kp - IN)))
    if (Ep, Kp, Np) != (E, IN, OUT):
        wp = jnp.pad(wp, ((0, Ep - E), (0, Kp - IN), (0, Np - OUT)))

    args = [xp, wp]
    in_specs = [
        pl.BlockSpec((et, tm, tk), lambda e, m, n, k: (e, m, k)),
        pl.BlockSpec((et, tk, tn), lambda e, m, n, k: (e, k, n)),
    ]
    if has_bias:
        bp = bias.astype(jnp.float32)
        if (Ep, Np) != (E, OUT):
            bp = jnp.pad(bp, ((0, Ep - E), (0, 0), (0, Np - OUT)))
        args.append(bp)
        in_specs.append(pl.BlockSpec((et, 1, tn), lambda e, m, n, k: (e, 0, n)))

    grid = (Ep // et, Mp // tm, Np // tn, nk)
    scratch_shapes = [pltpu.VMEM((et, tm, tn), jnp.float32)] if use_scratch else []

    # ---- VMEM request: double-buffered blocks (+ scratch) with headroom ----
    in_b = cdt.itemsize
    out_b = jnp.dtype(out_dtype).itemsize
    blk = et * (2 * tm * tk * in_b + 2 * tk * tn * in_b + 2 * tm * tn * out_b)
    if has_bias:
        blk += et * 2 * tn * 4
    if use_scratch:
        blk += et * tm * tn * 4
    vmem_limit = int(min(max(int(blk * 1.5), 4 * 1024 * 1024), vmem_cap))

    # ---- advisory cost: real (unpadded) FLOPs, re-streaming included ----
    bytes_accessed = (E * B * IN * in_b * (Np // tn)       # x re-fetched per n-block
                      + E * IN * OUT * in_b * (Mp // tm)   # w re-fetched per m-block
                      + (E * OUT * 4 if has_bias else 0)
                      + E * B * OUT * out_b)
    cost = pl.CostEstimate(flops=2 * E * B * IN * OUT, transcendentals=0,
                           bytes_accessed=int(bytes_accessed))

    out_p = pl.pallas_call(
        _build_kernel(has_bias, multi_k, use_scratch),
        out_shape=jax.ShapeDtypeStruct((Ep, Mp, Np), out_dtype),
        grid_spec=pltpu.PrefetchScalarGridSpec(
            num_scalar_prefetch=0,
            grid=grid,
            in_specs=in_specs,
            out_specs=pl.BlockSpec((et, tm, tn), lambda e, m, n, k: (e, m, n)),
            scratch_shapes=scratch_shapes,
        ),
        compiler_params=pltpu.CompilerParams(
            dimension_semantics=("parallel", "parallel", "parallel", "arbitrary"),
            vmem_limit_bytes=vmem_limit,
        ),
        cost_estimate=cost,
    )(*args)

    if (Ep, Mp, Np) != (E, B, OUT):
        out_p = out_p[:E, :B, :OUT]
    return out_p


def init_ensemble_linear_params(key, ensemble_size, in_feature, out_feature):
    """Deterministic init mirroring the PyTorch module: U(-k, k), k = sqrt(1/in)."""
    k = jnp.sqrt(1.0 / in_feature)
    kw, kb = jax.random.split(key)
    weight = jax.random.uniform(
        kw, (ensemble_size, in_feature, out_feature),
        dtype=jnp.float32, minval=-k, maxval=k)
    bias = jax.random.uniform(
        kb, (ensemble_size, 1, out_feature),
        dtype=jnp.float32, minval=-k, maxval=k)
    return weight, bias


if __name__ == "__main__":
    key = jax.random.PRNGKey(0)
    kx, kp, k2 = jax.random.split(key, 3)

    # --- tiny shape typical of the module (full-dim tiles, packed ensemble) ---
    E, B, IN, OUT = 4, 8, 32, 32
    x = jax.random.normal(kx, (E, B, IN), dtype=jnp.float32)
    weight, bias = init_ensemble_linear_params(kp, E, IN, OUT)
    out = jax.block_until_ready(ensemble_linear(x, weight, bias))
    ref = jnp.matmul(x, weight) + bias
    assert out.shape == (E, B, OUT)
    assert jnp.allclose(out, ref, atol=1e-5, rtol=1e-5)

    # --- larger shape exercising tiled N/K loops (f32 in-place accumulation) ---
    E2, B2, IN2, OUT2 = 2, 16, 256, 384
    x2 = jax.random.normal(k2, (E2, B2, IN2), dtype=jnp.float32)
    w2, b2 = init_ensemble_linear_params(kp, E2, IN2, OUT2)
    out2 = jax.block_until_ready(ensemble_linear(x2, w2, b2, tn=128, tk=128))
    ref2 = jnp.einsum("ebk,ekn->ebn", x2, w2,
                      precision=jax.lax.Precision.HIGHEST) + b2
    assert out2.shape == (E2, B2, OUT2)
    assert jnp.allclose(out2, ref2, atol=1e-3, rtol=1e-3)

    # --- bf16 compute path (halves HBM traffic; f32 accumulation) ---
    out3 = jax.block_until_ready(
        ensemble_linear(x2, w2, b2, tn=128, tk=128, compute_dtype=jnp.bfloat16))
    assert jnp.allclose(out3, ref2, atol=5e-2, rtol=5e-2)

    # --- bf16 output with multi-K (exercises the scratch-accumulator variant) ---
    out5 = jax.block_until_ready(
        ensemble_linear(x2.astype(jnp.bfloat16), w2, b2, tn=128, tk=128))
    assert out5.dtype == jnp.bfloat16
    assert jnp.allclose(out5.astype(jnp.float32), ref2, atol=5e-2, rtol=5e-2)

    # --- bias=None path (module's bias=False; bias-free kernel variant) ---
    out4 = jax.block_until_ready(ensemble_linear(x, weight, None))
    assert jnp.allclose(out4, jnp.matmul(x, weight), atol=1e-5, rtol=1e-5)

    print("KERNEL_OK")
</pallas_src>

<mosaic_0001>
module attributes {stable_mosaic.version = 11 : i64} {
  func.func @kernel(%arg0: i32, %arg1: i32, %arg2: i32, %arg3: i32, %arg4: memref<2x8x32xf32, #tpu.memory_space<vmem>>, %arg5: memref<2x32x32xf32, #tpu.memory_space<vmem>>, %arg6: memref<2x1x32xf32, #tpu.memory_space<vmem>>, %arg7: memref<2x8x32xf32, #tpu.memory_space<vmem>>) attributes {dimension_semantics = [#tpu.dimension_semantics<parallel>, #tpu.dimension_semantics<parallel>, #tpu.dimension_semantics<parallel>, #tpu.dimension_semantics<arbitrary>], iteration_bounds = array<i64: 2, 1, 1, 1>, scalar_prefetch = 0 : i64, scratch_operands = 0 : i64, tpu.core_type = #tpu.core_type<tc>, window_params = [{transform_indices = @transform_0, window_bounds = array<i64: 2, 8, 32>}, {transform_indices = @transform_1, window_bounds = array<i64: 2, 32, 32>}, {transform_indices = @transform_2, window_bounds = array<i64: 2, 1, 32>}, {transform_indices = @transform_3, window_bounds = array<i64: 2, 8, 32>}]} {
    %c0 = arith.constant 0 : index
    %c0_0 = arith.constant 0 : index
    %c0_1 = arith.constant 0 : index
    %0 = vector.load %arg4[%c0, %c0_0, %c0_1] : memref<2x8x32xf32, #tpu.memory_space<vmem>>, vector<2x8x32xf32>
    %c0_2 = arith.constant 0 : index
    %c0_3 = arith.constant 0 : index
    %c0_4 = arith.constant 0 : index
    %1 = vector.load %arg5[%c0_2, %c0_3, %c0_4] : memref<2x32x32xf32, #tpu.memory_space<vmem>>, vector<2x32x32xf32>
    %cst = arith.constant dense<0.000000e+00> : vector<2x8x32xf32>
    %2 = tpu.matmul %0, %1, %cst {dimension_numbers = #tpu.dot_dimension_numbers<[2], [1], [1], [2], [0, 0, 0, 1, 1, 2], [0], [0]>} : vector<2x8x32xf32>, vector<2x32x32xf32>, vector<2x8x32xf32> -> vector<2x8x32xf32>
    %c0_5 = arith.constant 0 : index
    %c0_6 = arith.constant 0 : index
    %c0_7 = arith.constant 0 : index
    %3 = vector.load %arg6[%c0_5, %c0_6, %c0_7] : memref<2x1x32xf32, #tpu.memory_space<vmem>>, vector<2x1x32xf32>
    %4 = vector.broadcast %3 : vector<2x1x32xf32> to vector<2x8x32xf32>
    %5 = arith.addf %2, %4 : vector<2x8x32xf32>
    %c0_8 = arith.constant 0 : index
    %c0_9 = arith.constant 0 : index
    %c0_10 = arith.constant 0 : index
    %6 = vector.load %arg7[%c0_8, %c0_9, %c0_10] : memref<2x8x32xf32, #tpu.memory_space<vmem>>, vector<2x8x32xf32>
    tpu.vector_store %arg7[%c0_8, %c0_9, %c0_10], %5 {strides = array<i32>} : memref<2x8x32xf32, #tpu.memory_space<vmem>>, vector<2x8x32xf32>,
    return
  }
  func.func @transform_0(%arg0: i32, %arg1: i32, %arg2: i32, %arg3: i32) -> (i32, i32, i32) {
    %c0_i32 = arith.constant 0 : i32
    return %arg0, %arg1, %arg3 : i32, i32, i32
  }
  func.func @transform_1(%arg0: i32, %arg1: i32, %arg2: i32, %arg3: i32) -> (i32, i32, i32) {
    %c0_i32 = arith.constant 0 : i32
    return %arg0, %arg3, %arg2 : i32, i32, i32
  }
  func.func @transform_2(%arg0: i32, %arg1: i32, %arg2: i32, %arg3: i32) -> (i32, i32, i32) {
    %c0_i32 = arith.constant 0 : i32
    %c0_i32_0 = arith.constant 0 : i32
    return %arg0, %c0_i32, %arg2 : i32, i32, i32
  }
  func.func @transform_3(%arg0: i32, %arg1: i32, %arg2: i32, %arg3: i32) -> (i32, i32, i32) {
    %c0_i32 = arith.constant 0 : i32
    return %arg0, %arg1, %arg2 : i32, i32, i32
  }
}

</mosaic_0001>

<bundles_post_ra>
// kernel: tpu_custom_call.1
= control target key start
LH: loop header
LB: loop body
LE: loop exit
PB: predicated region body
PF: predicated region fallthrough
CT: control target
= control target key end

     0   :  { %s1204_s0 = inlined_call_operand.hbm [shape: f32[4,8,32], index: 0, kind: input, shape index: {}]   ;;  %s1205_s1 = inlined_call_operand.hbm [shape: f32[4,32,32], index: 1, kind: input, shape index: {}]   ;;  %s1206_s2 = inlined_call_operand.hbm [shape: f32[4,1,32], index: 2, kind: input, shape index: {}]   ;;  %s1207_s3 = inlined_call_operand.hbm [shape: f32[4,8,32], index: 3, kind: output, shape index: {}]  }
   0x1   :  { %1210 = sst [smem:[#allocation14_spill]] %s1204_s0 }
   0x2   :  { %1211 = sst [smem:[#allocation15_spill]] %s1205_s1 }
   0x3   :  { %8 = vsyncpa [#allocation3], 0 }
   0x4   :  { %10 = vsyncpa [#allocation3 + $0x1], 0 }
   0x5   :  { %11 = vsyncpa [#allocation6], 0 }
   0x6   :  { %13 = vsyncpa [#allocation6 + $0x1], 0 }
   0x7   :  { %14 = vsyncpa [#allocation4], 0 }
   0x8   :  { %16 = vsyncpa [#allocation4 + $0x1], 0  ;;  %s993_s12 = smov 0   ;;  %s995_s13 = smov 0  }
   0x9   :  { %s997_s14 = smov 0   ;;  %s999_s15 = smov 0  }
   0xa   :  { %s1001_s16 = smov 0   ;;  %s1003_s17 = smov 0  }
   0xb LB: > { %s1024_s18 = sadd.s32 4294967295, %s959_s17   ;;  %s647_s19 = sadd.s32 4294967294, %s959_s17   ;;  %s959_s17 = sphi %s1003_s17, %s22_s17   ;;  %s955_s16 = sphi %s1001_s16, %s1229_s16   ;;  %s951_s15 = sphi %s999_s15, %s1228_s15   ;;  %s947_s14 = sphi %s997_s14, %s1227_s14   ;;  %s943_s13 = sphi %s995_s13, %s1226_s13   ;;  %s939_s12 = sphi %s993_s12, %s1225_s12  }
   0xc   : > { %s48_s20 = sadd.s32 1, %s955_s16  ;;  %s59_s21 = sadd.s32 1, %s947_s14 }
   0xd   : > { %p50_p0 = scmp.ge.s32.totalorder %s48_s20, 2  ;;  %p66_p1 = scmp.ne.s32.totalorder %s947_s14, %s943_s13 }
   0xe   : > { %p67_p2 = scmp.eq.s32.totalorder %s959_s17, 0  ;;  %p72_p3 = scmp.ne.s32.totalorder %s943_s13, %s939_s12 }
   0xf   : > { %s1231_s20 = smov (%p50_p0, %s48_s20), 0  ;;  %p73_p5 = scmp.eq.s32.totalorder %s1024_s18, 0 }
  0x10   : > { %1212 = sst [smem:[#allocation12_spill]] %s1231_s20  ;;  %p1036_p4 = por %p67_p2, %p66_p1 }
  0x11   : > { %s52_s23 = ssub.s32 %s955_s16, %s1231_s20  ;;  %p158_p6 = scmp.eq.s32.totalorder %s1024_s18, 1 }
  0x12   : > { %p57_p7 = scmp.eq.s32.totalorder %s52_s23, 0  ;;  %p1044_p8 = por %p73_p5, %p72_p3 }
  0x13   : > { %p1048_p9 = por %p158_p6, %p66_p1  ;;  %p164_p10 = scmp.eq.s32.totalorder %s647_s19, 1 }
  0x14   : > { %s1053_s26 = scalar_select %p57_p7, %s947_s14, %s59_s21  }
  0x15   : > { %p1055_p11 = por %p164_p10, %p72_p3  ;;  %p649_p12 = scmp.ge.s32.totalorder %s959_s17, 2 }
  0x16   : > { %1216 = sst [smem:[#allocation13_spill]] %s1053_s26  ;;  %p733_p13 = scmp.lt.s32.totalorder %s959_s17, 2 }
  0x17   : > { %s1062_s28 = sand.u32 1, %s947_s14   ;;  %s207_s30 = sand.u32 1, %s959_s17  }
  0x18   : > { %p1066_p0 = pnand %p733_p13, %p1036_p4  ;;  %s653_s4 = sshll.u32 %s1062_s28, 6 }
  0x19   : > { %s676_s5 = sshll.u32 %s955_s16, 10  ;;  %s211_s6 = scalar_lea.vmem [#allocation5], %s653_s4 }
  0x1a   : > { %s222_s7 = sshll.u32 %s211_s6, 4  ;;  %s1219_s1 = sld [smem:[#allocation15_spill]]  ;;  %s223_s7 = int_to_ptr.vmem [resolvable:$true] %s222_s7 }
  0x1b   : > { %s1076_s11 = scalar_lea.sflag [#allocation6], %s207_s30  ;;  %p793_p1 = pneg %p1066_p0 }
  0x1c   : > { %s804_s19 = scalar_lea.vmem %s223_s7, 1024  ;;  %s961_s21 = smov [#allocation5]  }
  0x1d   : > { %p805_p2 = scmp.ne.s32.totalorder %s223_s7, %s804_s19  ;;  %s809_s22 = sshll.u32 %s961_s21, 4  ;;  %s810_s22 = int_to_ptr.vmem [resolvable:$false] %s809_s22 }
  0x1e   : > { %s811_s23 = scalar_lea.vmem %s810_s22, 2048  ;;  %p812_p5 = scmp.lt.s32.totalorder %s223_s7, %s810_s22 }
  0x1f   : > { %p807_p3 = pnand %p805_p2, %p793_p1  ;;  %p813_p6 = scmp.lt.s32.totalorder %s811_s23, %s804_s19 }
  0x20   : > { %s221_s10 = scalar_lea.hbm %s1219_s1, %s676_s5 }
  0x21   : > { %p808_p4 = pneg %p807_p3  ;;  %p814_p7 = por %p813_p6, %p812_p5 }
  0x23   : > { %p815_p10 = pnand %p814_p7, %p808_p4 }
  0x25   : > { %818 = shalt.err (!%p815_p10)
}
  0x26   : > { %s1209_s4 = smov 128   ;;  %s963_s30 = smov 8  }
  0x27   : > { %725 = dma.hbm_to_vmem [thread:$0]  (!%p1066_p0), %s221_s10, 1024, %s223_s7, %s1076_s11, %s1209_s4, %s1209_s4, %s963_s30  }
  0x28   : > { %p660_p13 = scmp.ge.s32.totalorder %s959_s17, 1  ;;  %p252_p2 = scmp.lt.s32.totalorder %s959_s17, 3 }
  0x29   : > { %s650_s6 = sshll.u32 %s1062_s28, 4  ;;  %s674_s8 = sshll.u32 %s955_s16, 8 }
  0x2a   : > { %p1091_p3 = pnand %p660_p13, %p252_p2  ;;  %s1221_s0 = sld [smem:[#allocation14_spill]] }
  0x2b   : > { %s188_s22 = scalar_lea.vmem [#allocation2], %s650_s6  ;;  %s657_s1 = sshll.u32 %s1062_s28, 1 }
  0x2c   : > { %s197_s23 = sshll.u32 %s188_s22, 4  ;;  %s185_s20 = scalar_lea.sflag [#allocation3], %s1062_s28  ;;  %s198_s23 = int_to_ptr.vmem [resolvable:$true] %s197_s23 }
  0x2d   : > { %s832_s26 = scalar_lea.vmem %s198_s23, 256  ;;  %s964_s7 = smov [#allocation2]  }
  0x2e   : > { %p833_p4 = scmp.ne.s32.totalorder %s198_s23, %s832_s26  ;;  %s837_s10 = sshll.u32 %s964_s7, 4  ;;  %s838_s10 = int_to_ptr.vmem [resolvable:$false] %s837_s10 }
  0x2f   : > { %s839_s4 = scalar_lea.vmem %s838_s10, 512  ;;  %p840_p7 = scmp.lt.s32.totalorder %s198_s23, %s838_s10 }
  0x30   : > { %s196_s21 = scalar_lea.hbm %s1221_s0, %s674_s8  ;;  %p835_p5 = pnand %p833_p4, %p793_p1 }
  0x31   : > { %p841_p10 = scmp.lt.s32.totalorder %s839_s4, %s832_s26 }
  0x32   : > { %p836_p6 = pneg %p835_p5 }
  0x33   : > { %p842_p13 = por %p841_p10, %p840_p7 }
  0x35   : > { %p843_p2 = pnand %p842_p13, %p836_p6 }
  0x37   : > { %846 = shalt.err (!%p843_p2)
}
  0x38   : > { %s1222_s6 = smov 128   ;;  %s677_s28 = sshll.u32 %s955_s16, 5 }
  0x39   : > { %722 = dma.hbm_to_vmem [thread:$0]  (!%p1066_p0), %s196_s21, 256, %s198_s23, %s185_s20, %s1222_s6, %s1222_s6, %s963_s30  }
  0x3a   : > { %s236_s8 = scalar_lea.vmem [#allocation7], %s657_s1  ;;  %s243_s7 = scalar_lea.hbm %s1206_s2, %s677_s28 }
  0x3b   : > { %s244_s9 = sshll.u32 %s236_s8, 4  ;;  %s965_s4 = smov [#allocation7]   ;;  %s245_s9 = int_to_ptr.vmem [resolvable:$true] %s244_s9 }
  0x3c   : > { %s860_s26 = scalar_lea.vmem %s245_s9, 32  ;;  %s865_s10 = sshll.u32 %s965_s4, 4  ;;  %s866_s10 = int_to_ptr.vmem [resolvable:$false] %s865_s10 }
  0x3d   : > { %p861_p4 = scmp.ne.s32.totalorder %s245_s9, %s860_s26  ;;  %s867_s0 = scalar_lea.vmem %s866_s10, 64 }
  0x3e   : > { %p868_p7 = scmp.lt.s32.totalorder %s245_s9, %s866_s10  ;;  %p869_p10 = scmp.lt.s32.totalorder %s867_s0, %s860_s26 }
  0x3f   : > { %p863_p5 = pnand %p861_p4, %p793_p1 }
  0x40   : > { %p870_p13 = por %p869_p10, %p868_p7 }
  0x41   : > { %p864_p6 = pneg %p863_p5 }
  0x43   : > { %p871_p2 = pnand %p870_p13, %p864_p6 }
  0x45   : > { %874 = shalt.err (!%p871_p2)
}
  0x46   : > { %s966_s1 = smov 16   ;;  %s967_s20 = smov 1  }
  0x47   : > { %728 = dma.hbm_to_vmem [thread:$0]  (!%p1066_p0), %s243_s7, 32, %s245_s9, %s1076_s11, %s966_s1, %s966_s1, %s967_s20  }
  0x48   : > { %256 = sbr.rel (%p1091_p3) target bundleno = 300 (0x12c), region = 32  ;;  %s1123_s30 = sand.u32 (!%p1091_p3), 1, %s943_s13  }
  0x49   : > { %s661_s0 = sshll.u32 (!%p1091_p3), %s1123_s30, 4  ;;  %s259_s21 = scalar_lea.sflag (!%p1091_p3), [#allocation3], %s1123_s30 }
  0x4a   : > { %s1129_s23 = scalar_lea.vmem (!%p1091_p3), [#allocation2], %s661_s0 }
  0x4d   : > { %926 = dma.done.wait (%p1044_p8), %s259_s21, 256  }
  0x4e   : > { %928 = vsyncadd (%p1044_p8), %s259_s21, 4294967040  ;;  %s267_s29 = sand.u32 1, %s1024_s18   ;;  %s662_s11 = sshll.u32 %s1123_s30, 6 }
  0x4f   : > { %s268_s5 = scalar_lea.sflag [#allocation6], %s267_s29  ;;  %s271_s6 = scalar_lea.vmem [#allocation5], %s662_s11 }
  0x50   : > { %930 = dma.done.wait (%p1044_p8), %s268_s5, 1056  }
  0x51   : > { %932 = vsyncadd (%p1044_p8), %s268_s5, 4294966240  ;;  %v968_v0 = vmov 0.0   ;;  %vm969_vm0 = vmmov 0   ;;  %v323_v1 = vld [vmem:[%s271_s6 + $0x18] sm:$0xff]  ;;  %v322_v3 = vld [vmem:[%s271_s6 + $0x10] sm:$0xff]  ;;  %vm342_vm1 = vcmask 261120  }
  0x52   : > { %689 = vmatprep.subr.mxu0 %v968_v0  ;;  %700 = vmatprep.subr.mxu1 %v968_v0  ;;  %v327_v2 = vld [vmem:[%s271_s6 + $0x38] sm:$0xff]  ;;  %v326_v4 = vld [vmem:[%s271_s6 + $0x30] sm:$0xff]  ;;  %v321_v5 = vld [vmem:[%s271_s6 + $0x8] sm:$0xff]  ;;  %s663_s18 = sshll.u32 %s1123_s30, 1  ;;  %s312_s24 = scalar_lea.vmem [#allocation8], %s661_s0 }
  0x53   : > { %697 = vmatprep.mubr.msk.f32.mxu0 %vm969_vm0, %v968_v0  ;;  %708 = vmatprep.mubr.msk.f32.mxu1 %vm969_vm0, %v968_v0  ;;  %v325_v6 = vld [vmem:[%s271_s6 + $0x28] sm:$0xff]  ;;  %v320_v7 = vld [vmem:[%s271_s6] sm:$0xff]  ;;  %s507_s28 = sshll.u32 %s312_s24, 4  ;;  %s678_s8 = sshll.u32 %s951_s15, 8  ;;  %s1149_s28 = int_to_ptr.vmem [resolvable:$true] %s507_s28 }
  0x54   : > { %690 = vmatpush3.msra.mxu0 %v323_v1  ;;  %701 = vmatpush3.msra.mxu1 %v327_v2  ;;  %v324_v8 = vld [vmem:[%s271_s6 + $0x20] sm:$0xff]  ;;  %v319_v10 = vld [vmem:[%s1129_s23 + $0x8] sm:$0xff]  ;;  %s280_s9 = scalar_lea.vmem [#allocation7], %s663_s18  ;;  %s1154_s7 = scalar_lea.hbm %s1207_s3, %s678_s8 }
  0x55   : > { %691 = vmatprep.subr.mxu0 %v968_v0  ;;  %702 = vmatprep.subr.mxu1 %v968_v0  ;;  %v318_v9 = vld [vmem:[%s1129_s23] sm:$0xff]  ;;  %s492_s15 = scalar_lea.sflag [#allocation4], %s1123_s30  ;;  %s875_s26 = scalar_lea.vmem %s1149_s28, 256 }
  0x56   : > { %692 = vmatpush3.msra.mxu0 %v322_v3  ;;  %703 = vmatpush3.msra.mxu1 %v326_v4  ;;  %v665_v11 = vld [vmem:[%s280_s9] ss:$0 sm:$0xff]  ;;  %v666_v12 = vld [vmem:[%s280_s9 + $0x1] ss:$0 sm:$0xff]  ;;  %p876_p8 = scmp.ne.s32.totalorder %s1149_s28, %s875_s26  ;;  %s970_s4 = smov [#allocation8]  }
  0x57   : > { %693 = vmatprep.subr.mxu0 %v968_v0  ;;  %704 = vmatprep.subr.mxu1 %v968_v0  ;;  %s879_s10 = sshll.u32 %s970_s4, 4  ;;  %s880_s10 = int_to_ptr.vmem [resolvable:$false] %s879_s10 }
  0x58   : > { %694 = vmatpush3.msra.mxu0 %v321_v5  ;;  %705 = vmatpush3.msra.mxu1 %v325_v6  ;;  %p877_p0 = pnand %p876_p8, %p1048_p9  ;;  %s881_s1 = scalar_lea.vmem %s880_s10, 512 }
  0x59   : > { %695 = vmatprep.subr.mxu0 %v968_v0  ;;  %706 = vmatprep.subr.mxu1 %v968_v0  ;;  %p882_p3 = scmp.lt.s32.totalorder %s1149_s28, %s880_s10  ;;  %p883_p4 = scmp.lt.s32.totalorder %s881_s1, %s875_s26 }
  0x5a   : > { %696 = vmatpush3.msra.mxu0 %v320_v7  ;;  %707 = vmatpush3.msra.mxu1 %v324_v8  ;;  %p878_p1 = pneg %p877_p0 }
  0x5b   : > { %698 = vmatmul.mubr.msk.f32.vlgmr.msra.gmra.mxu0 %vm342_vm1, %v318_v9  ;;  %709 = vmatmul.mubr.msk.f32.vlgmr.msra.gmra.mxu1 %vm342_vm1, %v319_v10  ;;  %p884_p5 = por %p883_p4, %p882_p3 }
  0x5d   : > { %p885_p6 = pnand %p884_p5, %p878_p1 }
 0x11b   : > { %v412_v13 = vpop.f32.mrf.mxu0  ;;  %v485_v14 = vpop.f32.mrf.mxu1 }
 0x11c   : > { %v413_v15 = vadd.f32 %v665_v11, %v412_v13  ;;  %v486_v16 = vadd.f32 %v666_v12, %v485_v14 }
 0x11d   : > { %v699_v17 = vpop.f32.mrf.mxu0  ;;  %v710_v18 = vpop.f32.mrf.mxu1 }
 0x11e   : > { %489 = vst.msk [vmem:[%s312_s24] sm:$0xff] %vm342_vm1, %v413_v15  ;;  %490 = vst.msk [vmem:[%s312_s24 + $0x8] sm:$0xff] %vm342_vm1, %v486_v16 }
 0x11f   : > { %888 = shalt.err (!%p885_p6)
}
 0x120   : > { %s889_s20 = scalar_lea.hbm %s1154_s7, 256  ;;  %s893_s23 = scalar_lea.hbm %s1207_s3, 512 }
 0x121   : > { %p890_p7 = scmp.ne.s32.totalorder %s1154_s7, %s889_s20  ;;  %p894_p2 = scmp.lt.s32.totalorder %s1154_s7, %s1207_s3 }
 0x122   : > { %p895_p8 = scmp.lt.s32.totalorder %s893_s23, %s889_s20 }
 0x123   : > { %p891_p10 = pnand %p890_p7, %p1048_p9 }
 0x124   : > { %p896_p0 = por %p895_p8, %p894_p2 }
 0x125   : > { %p892_p13 = pneg %p891_p10 }
 0x127   : > { %p897_p1 = pnand %p896_p0, %p892_p13 }
 0x129   : > { %900 = shalt.err (!%p897_p1)
}
 0x12a   : > { %s971_s5 = smov 128   ;;  %s972_s6 = smov 8  }
 0x12b   : > { %717 = dma.vmem_to_hbm [thread:$0]  (%p1048_p9), %s1149_s28, 256, %s1154_s7, %s492_s15, %s971_s5, %s971_s5, %s972_s6  }
 0x12c PF: > { %s522_s18 = sand.u32 1, %s939_s12   ;;  %p730_p3 = pnand %p649_p12, %p1055_p11 }
 0x12d   : > { %s523_s24 = scalar_lea.sflag [#allocation4], %s522_s18 }
 0x12e   : > { %p731_p4 = pneg %p730_p3 }
 0x130   : > { %934 = dma.done.wait (%p731_p4), %s523_s24, 256  }
 0x131   : > { %936 = vsyncadd (%p731_p4), %s523_s24, 4294967040  ;;  %s22_s17 = sadd.s32 1, %s959_s17   ;;  %s1223_s25 = sld [smem:[#allocation13_spill]] }
 0x132   : > { %p19_p5 = scmp.ge.s32.totalorder %s22_s17, 4   ;;  %s1224_s30 = sld [smem:[#allocation12_spill]] }
 0x133   : > { %s1225_s12 = smov %s943_s13  ;;  %s1226_s13 = smov %s947_s14 }
 0x134   : > { %s1228_s15 = smov %s955_s16  ;;  %21 = sbr.rel (!%p19_p5) target bundleno = 11 (0xb), region = 101 }
 0x137   : > { %s1227_s14 = smov %s1223_s25 }
 0x138   : > { %s1229_s16 = smov %s1224_s30 }
 0x139   :  { %528 = vsyncpa [#allocation3], 1 }
 0x13a   :  { %530 = vsyncpa [#allocation3 + $0x1], 1 }
 0x13b   :  { %531 = vsyncpa [#allocation6], 1 }
 0x13c   :  { %533 = vsyncpa [#allocation6 + $0x1], 1 }
 0x13d   :  { %534 = vsyncpa [#allocation4], 1 }
 0x13e   :  { %536 = vsyncpa [#allocation4 + $0x1], 1 }

</bundles_post_ra>
